<compile_context>
chip_gen: v7x
topology: tpu7x:2x2x1
jax: 0.10.0
libtpu: 0.0.40
codegen_flags: <defaults>
</compile_context>

<pallas_src>
import jax
import jax.numpy as jnp
from jax import lax
from jax.experimental import pallas as pl
from jax.experimental.pallas import tpu as pltpu


def _round_up(x, m):
    return ((x + m - 1) // m) * m


def _pick_pix_tile(ohw, pix_tile):
    """Pixels handled per grid step.  Returns (TM, OHW_padded)."""
    if ohw <= pix_tile:
        return ohw, ohw                        # whole image per step (full dims)
    # Prefer a multiple-of-128 divisor of OHW: tiled lane-dense stores and a
    # free final slice/reshape (no output padding).
    t = (pix_tile // 128) * 128
    while t >= 128:
        if ohw % t == 0:
            return t, ohw
        t -= 128
    # Fallback: pad the pixel axis (costs one output slice copy at the end).
    tm = max((pix_tile // 128) * 128, 128)
    return tm, _round_up(ohw, tm)


def _stats_kernel(p_ref, w_ref, stats_ref):
    """Conv-as-matmul on the MXU -> per-block partial per-channel sum / sumsq."""
    acc = jnp.dot(p_ref[0], w_ref[...], preferred_element_type=jnp.float32)  # (TM, C)
    s1 = jnp.sum(acc, axis=0, keepdims=True)                                 # (1, C)
    s2 = jnp.sum(acc * acc, axis=0, keepdims=True)                           # (1, C)
    # Single dense (8, C) store: rows 0/1 carry sum/sumsq, rows 2..7 are zero.
    row = lax.broadcasted_iota(jnp.int32, stats_ref.shape[2:], 0)            # (8, C)
    stats_ref[0, 0] = jnp.where(row == 0, s1, jnp.where(row == 1, s2, 0.0))


def _conv_bn_relu_kernel(p_ref, w_ref, b_ref, o_ref):
    """Recompute the cheap K=27 conv matmul channel-major, add folded BN bias, ReLU."""
    # (Cout, K) x (TM, K)^T -> (Cout, TM): lane dim is pixels -> dense stores,
    # and the NCHW result needs no output transpose.
    acc = lax.dot_general(
        w_ref[...], p_ref[0],
        dimension_numbers=(((1,), (1,)), ((), ())),
        preferred_element_type=jnp.float32)                                  # (C, TM)
    o_ref[0] = jnp.maximum(acc + b_ref[...], 0.0).astype(o_ref.dtype)


def stem_forward(x, weight, gamma, beta, *, eps=1e-5, pix_tile=8192,
                 out_dtype=jnp.bfloat16):
    """x: (N, 3, H, W) NCHW; weight: (Cout, 3, 3, 3) (PyTorch OIHW layout).

    Returns (N, Cout, OH, OW) = ReLU(BatchNorm_train(Conv2d(x))).
    """
    N, Cin, H, W = x.shape
    Cout = weight.shape[0]
    KH = KW = 3
    stride = 2
    OH = (H + 2 - KH) // stride + 1
    OW = (W + 2 - KW) // stride + 1
    OHW = OH * OW
    K = KH * KW * Cin                       # 27
    M = N * OHW                             # true pixel count for BN stats

    # ---- XLA glue, all in bf16: NCHW->NHWC, pad=1, im2col -> (N, OHW, 27) ----
    x_pad = jnp.pad(jnp.transpose(x.astype(jnp.bfloat16), (0, 2, 3, 1)),
                    ((0, 0), (1, 1), (1, 1), (0, 0)))
    taps = [x_pad[:, kh:kh + stride * OH:stride, kw:kw + stride * OW:stride, :]
            for kh in range(KH) for kw in range(KW)]
    patches = jnp.stack(taps, axis=3).reshape(N, OHW, K)     # tap-major, ch-minor

    TM, OHW_pad = _pick_pix_tile(OHW, pix_tile)
    if OHW_pad != OHW:
        # Inert zero rows: contribute 0 to sum / sumsq (divide by true M below)
        # and the corresponding output columns are sliced off at the end.
        patches = jnp.pad(patches, ((0, 0), (0, OHW_pad - OHW), (0, 0)))
    n_blk = OHW_pad // TM

    # PyTorch (Cout, Cin, KH, KW) -> (K, Cout) matching the patch row layout.
    w_mat = jnp.transpose(weight, (2, 3, 1, 0)).reshape(K, Cout).astype(jnp.float32)

    cparams = pltpu.CompilerParams(
        dimension_semantics=("parallel", "parallel"),
        vmem_limit_bytes=32 * 1024 * 1024)

    # ---- kernel 1: conv matmul -> per-block partial batch statistics ----
    partial = pl.pallas_call(
        _stats_kernel,
        out_shape=jax.ShapeDtypeStruct((N, n_blk, 8, Cout), jnp.float32),
        grid_spec=pltpu.PrefetchScalarGridSpec(
            num_scalar_prefetch=0,
            grid=(N, n_blk),
            in_specs=[pl.BlockSpec((1, TM, K), lambda n, i: (n, i, 0)),
                      pl.BlockSpec((K, Cout), lambda n, i: (0, 0))],
            out_specs=pl.BlockSpec((1, 1, 8, Cout), lambda n, i: (n, i, 0, 0))),
        compiler_params=cparams,
    )(patches, w_mat.astype(jnp.bfloat16))

    # Tiny cross-block reduction + BN affine fold (negligible bytes, left to XLA).
    stats = jnp.sum(partial[:, :, :2, :], axis=(0, 1))        # (2, Cout)
    mean = stats[0] / M
    var = jnp.maximum(stats[1] / M - mean * mean, 0.0)        # clamp: cancellation guard
    scale_c = gamma.astype(jnp.float32) * lax.rsqrt(var + eps)
    bias_c = beta.astype(jnp.float32) - mean * scale_c

    # Fold the BN scale into the transposed weight; kernel 2 only adds the bias.
    w_scaled_t = (w_mat * scale_c[None, :]).T.astype(jnp.bfloat16)   # (Cout, K)
    bias_col = bias_c.reshape(Cout, 1)                               # (Cout, 1) f32

    # ---- kernel 2: recompute conv (channel-major) fused with bias + ReLU ----
    out_cm = pl.pallas_call(
        _conv_bn_relu_kernel,
        out_shape=jax.ShapeDtypeStruct((N, Cout, OHW_pad), out_dtype),
        grid_spec=pltpu.PrefetchScalarGridSpec(
            num_scalar_prefetch=0,
            grid=(N, n_blk),
            in_specs=[pl.BlockSpec((1, TM, K), lambda n, i: (n, i, 0)),
                      pl.BlockSpec((Cout, K), lambda n, i: (0, 0)),
                      pl.BlockSpec((Cout, 1), lambda n, i: (0, 0))],
            out_specs=pl.BlockSpec((1, Cout, TM), lambda n, i: (n, 0, i))),
        compiler_params=cparams,
    )(patches, w_scaled_t, bias_col)

    # Channel-major (N, Cout, OHW) reshapes to NCHW for free (no transpose).
    if OHW_pad != OHW:
        out_cm = out_cm[:, :, :OHW]
    return out_cm.reshape(N, Cout, OH, OW)


def _reference(x, weight, gamma, beta, eps=1e-5):
    """Pure-JAX reference (NCHW conv + training-mode BN + ReLU)."""
    conv = lax.conv_general_dilated(
        x, weight, window_strides=(2, 2), padding=((1, 1), (1, 1)),
        dimension_numbers=("NCHW", "OIHW", "NCHW"),
        precision=lax.Precision.HIGHEST)
    mean = jnp.mean(conv, axis=(0, 2, 3), keepdims=True)
    var = jnp.mean((conv - mean) ** 2, axis=(0, 2, 3), keepdims=True)
    y = (conv - mean) * lax.rsqrt(var + eps)
    y = y * gamma.reshape(1, -1, 1, 1) + beta.reshape(1, -1, 1, 1)
    return jnp.maximum(y, 0.0)


if __name__ == "__main__":
    base_key = jax.random.PRNGKey(0)

    def run_case(case_id, n, h, w, cout, pix_tile):
        k1, k2, k3, k4 = jax.random.split(jax.random.fold_in(base_key, case_id), 4)
        x = jax.random.normal(k1, (n, 3, h, w), dtype=jnp.float32)
        weight = jax.random.normal(k2, (cout, 3, 3, 3), dtype=jnp.float32) * 0.1
        gamma = jax.random.uniform(k3, (cout,), dtype=jnp.float32,
                                   minval=0.5, maxval=1.5)
        beta = jax.random.normal(k4, (cout,), dtype=jnp.float32) * 0.1

        fwd = jax.jit(lambda a, b, c, d: stem_forward(a, b, c, d, pix_tile=pix_tile))
        out = jax.block_until_ready(fwd(x, weight, gamma, beta))

        oh, ow = (h - 1) // 2 + 1, (w - 1) // 2 + 1
        assert out.shape == (n, cout, oh, ow), (case_id, out.shape)
        ref = _reference(x, weight, gamma, beta)
        out_f32 = out.astype(jnp.float32)
        ok = jnp.allclose(out_f32, ref, atol=5e-2, rtol=5e-2)
        assert bool(ok), (case_id, float(jnp.max(jnp.abs(out_f32 - ref))))

    # Primary small case: whole-image path, grid (2, 1) -> 2 parallel blocks.
    run_case(0, n=2, h=16, w=16, cout=32, pix_tile=8192)
    # Multi pixel-block path: OHW=256 -> TM=128, 2 blocks per image, no padding.
    run_case(1, n=2, h=32, w=32, cout=32, pix_tile=128)
    # Padded pixel path: OHW=272 -> padded to 384 (inert zero rows + output slice).
    run_case(2, n=1, h=32, w=34, cout=32, pix_tile=128)

    print("KERNEL_OK")
</pallas_src>

<mosaic_0001>
module attributes {stable_mosaic.version = 11 : i64} {
  func.func @_stats_kernel(%arg0: i32, %arg1: i32, %arg2: memref<1x64x27xbf16, #tpu.memory_space<vmem>>, %arg3: memref<27x32xbf16, #tpu.memory_space<vmem>>, %arg4: memref<1x1x8x32xf32, #tpu.memory_space<vmem>>) attributes {dimension_semantics = [#tpu.dimension_semantics<parallel>, #tpu.dimension_semantics<parallel>], iteration_bounds = array<i64: 2, 1>, scalar_prefetch = 0 : i64, scratch_operands = 0 : i64, tpu.core_type = #tpu.core_type<tc>, window_params = [{transform_indices = @transform_0, window_bounds = array<i64: 1, 64, 27>}, {pipeline_mode = #tpu.pipeline_mode<synchronous>, transform_indices = @transform_1, window_bounds = array<i64: 27, 32>}, {transform_indices = @transform_2, window_bounds = array<i64: 1, 1, 8, 32>}]} {
    %c0 = arith.constant 0 : index
    %c0_0 = arith.constant 0 : index
    %c0_1 = arith.constant 0 : index
    %0 = vector.load %arg2[%c0, %c0_0, %c0_1] : memref<1x64x27xbf16, #tpu.memory_space<vmem>>, vector<1x64x27xbf16>
    %1 = vector.shape_cast %0 : vector<1x64x27xbf16> to vector<64x27xbf16>
    %c0_2 = arith.constant 0 : index
    %c0_3 = arith.constant 0 : index
    %2 = vector.load %arg3[%c0_2, %c0_3] : memref<27x32xbf16, #tpu.memory_space<vmem>>, vector<27x32xbf16>
    %cst = arith.constant dense<0.000000e+00> : vector<64x32xf32>
    %3 = tpu.matmul %1, %2, %cst {dimension_numbers = #tpu.dot_dimension_numbers<[1], [0], [0], [1], [0, 0, 1, 1], [], []>} : vector<64x27xbf16>, vector<27x32xbf16>, vector<64x32xf32> -> vector<64x32xf32>
    %cst_4 = arith.constant dense<0.000000e+00> : vector<32xf32>
    %4 = vector.multi_reduction <add>, %3, %cst_4 [0] : vector<64x32xf32> to vector<32xf32>
    %5 = vector.shape_cast %4 : vector<32xf32> to vector<1x32xf32>
    %6 = arith.mulf %3, %3 : vector<64x32xf32>
    %cst_5 = arith.constant dense<0.000000e+00> : vector<32xf32>
    %7 = vector.multi_reduction <add>, %6, %cst_5 [0] : vector<64x32xf32> to vector<32xf32>
    %8 = vector.shape_cast %7 : vector<32xf32> to vector<1x32xf32>
    %9 = tpu.iota {dimensions = array<i32: 0>} : vector<8x32xi32>
    %c0_i32 = arith.constant 0 : i32
    %10 = vector.broadcast %c0_i32 : i32 to vector<8x32xi32>
    %11 = arith.cmpi eq, %9, %10 : vector<8x32xi32>
    %c1_i32 = arith.constant 1 : i32
    %12 = vector.broadcast %c1_i32 : i32 to vector<8x32xi32>
    %13 = arith.cmpi eq, %9, %12 : vector<8x32xi32>
    %cst_6 = arith.constant 0.000000e+00 : f32
    %14 = vector.shape_cast %8 : vector<1x32xf32> to vector<1x32xf32>
    %15 = vector.broadcast %14 : vector<1x32xf32> to vector<8x32xf32>
    %16 = vector.broadcast %cst_6 : f32 to vector<8x32xf32>
    %17 = arith.select %13, %15, %16 : vector<8x32xi1>, vector<8x32xf32>
    %18 = vector.shape_cast %5 : vector<1x32xf32> to vector<1x32xf32>
    %19 = vector.broadcast %18 : vector<1x32xf32> to vector<8x32xf32>
    %20 = arith.select %11, %19, %17 : vector<8x32xi1>, vector<8x32xf32>
    %c0_7 = arith.constant 0 : index
    %c0_8 = arith.constant 0 : index
    %c0_9 = arith.constant 0 : index
    %c0_10 = arith.constant 0 : index
    %21 = vector.load %arg4[%c0_7, %c0_8, %c0_9, %c0_10] : memref<1x1x8x32xf32, #tpu.memory_space<vmem>>, vector<1x1x8x32xf32>
    %22 = vector.shape_cast %21 : vector<1x1x8x32xf32> to vector<8x32xf32>
    %23 = vector.shape_cast %20 : vector<8x32xf32> to vector<1x1x8x32xf32>
    tpu.vector_store %arg4[%c0_7, %c0_8, %c0_9, %c0_10], %23 {strides = array<i32>} : memref<1x1x8x32xf32, #tpu.memory_space<vmem>>, vector<1x1x8x32xf32>,
    return
  }
  func.func @transform_0(%arg0: i32, %arg1: i32) -> (i32, i32, i32) {
    %c0_i32 = arith.constant 0 : i32
    %c0_i32_0 = arith.constant 0 : i32
    return %arg0, %arg1, %c0_i32 : i32, i32, i32
  }
  func.func @transform_1(%arg0: i32, %arg1: i32) -> (i32, i32) {
    %c0_i32 = arith.constant 0 : i32
    %c0_i32_0 = arith.constant 0 : i32
    %c0_i32_1 = arith.constant 0 : i32
    return %c0_i32, %c0_i32_0 : i32, i32
  }
  func.func @transform_2(%arg0: i32, %arg1: i32) -> (i32, i32, i32, i32) {
    %c0_i32 = arith.constant 0 : i32
    %c0_i32_0 = arith.constant 0 : i32
    %c0_i32_1 = arith.constant 0 : i32
    return %arg0, %arg1, %c0_i32, %c0_i32_0 : i32, i32, i32, i32
  }
}

module attributes {stable_mosaic.version = 11 : i64} {
  func.func @_conv_bn_relu_kernel(%arg0: i32, %arg1: i32, %arg2: memref<1x64x27xbf16, #tpu.memory_space<vmem>>, %arg3: memref<32x27xbf16, #tpu.memory_space<vmem>>, %arg4: memref<32x1xf32, #tpu.memory_space<vmem>>, %arg5: memref<1x32x64xbf16, #tpu.memory_space<vmem>>) attributes {dimension_semantics = [#tpu.dimension_semantics<parallel>, #tpu.dimension_semantics<parallel>], iteration_bounds = array<i64: 2, 1>, scalar_prefetch = 0 : i64, scratch_operands = 0 : i64, tpu.core_type = #tpu.core_type<tc>, window_params = [{transform_indices = @transform_0, window_bounds = array<i64: 1, 64, 27>}, {pipeline_mode = #tpu.pipeline_mode<synchronous>, transform_indices = @transform_1, window_bounds = array<i64: 32, 27>}, {pipeline_mode = #tpu.pipeline_mode<synchronous>, transform_indices = @transform_2, window_bounds = array<i64: 32, 1>}, {transform_indices = @transform_3, window_bounds = array<i64: 1, 32, 64>}]} {
    %c0 = arith.constant 0 : index
    %c0_0 = arith.constant 0 : index
    %0 = vector.load %arg3[%c0, %c0_0] : memref<32x27xbf16, #tpu.memory_space<vmem>>, vector<32x27xbf16>
    %c0_1 = arith.constant 0 : index
    %c0_2 = arith.constant 0 : index
    %c0_3 = arith.constant 0 : index
    %1 = vector.load %arg2[%c0_1, %c0_2, %c0_3] : memref<1x64x27xbf16, #tpu.memory_space<vmem>>, vector<1x64x27xbf16>
    %2 = vector.shape_cast %1 : vector<1x64x27xbf16> to vector<64x27xbf16>
    %cst = arith.constant dense<0.000000e+00> : vector<32x64xf32>
    %3 = tpu.matmul %0, %2, %cst {dimension_numbers = #tpu.dot_dimension_numbers<[1], [1], [0], [0], [0, 0, 1, 0], [], []>} : vector<32x27xbf16>, vector<64x27xbf16>, vector<32x64xf32> -> vector<32x64xf32>
    %c0_4 = arith.constant 0 : index
    %c0_5 = arith.constant 0 : index
    %4 = vector.load %arg4[%c0_4, %c0_5] : memref<32x1xf32, #tpu.memory_space<vmem>>, vector<32x1xf32>
    %5 = vector.broadcast %4 : vector<32x1xf32> to vector<32x64xf32>
    %6 = arith.addf %3, %5 : vector<32x64xf32>
    %cst_6 = arith.constant 0.000000e+00 : f32
    %7 = vector.broadcast %cst_6 : f32 to vector<32x64xf32>
    %8 = arith.maximumf %6, %7 : vector<32x64xf32>
    %9 = arith.truncf %8 : vector<32x64xf32> to vector<32x64xbf16>
    %c0_7 = arith.constant 0 : index
    %c0_8 = arith.constant 0 : index
    %c0_9 = arith.constant 0 : index
    %10 = vector.load %arg5[%c0_7, %c0_8, %c0_9] : memref<1x32x64xbf16, #tpu.memory_space<vmem>>, vector<1x32x64xbf16>
    %11 = vector.shape_cast %10 : vector<1x32x64xbf16> to vector<32x64xbf16>
    %12 = vector.shape_cast %9 : vector<32x64xbf16> to vector<1x32x64xbf16>
    tpu.vector_store %arg5[%c0_7, %c0_8, %c0_9], %12 {strides = array<i32>} : memref<1x32x64xbf16, #tpu.memory_space<vmem>>, vector<1x32x64xbf16>,
    return
  }
  func.func @transform_0(%arg0: i32, %arg1: i32) -> (i32, i32, i32) {
    %c0_i32 = arith.constant 0 : i32
    %c0_i32_0 = arith.constant 0 : i32
    return %arg0, %arg1, %c0_i32 : i32, i32, i32
  }
  func.func @transform_1(%arg0: i32, %arg1: i32) -> (i32, i32) {
    %c0_i32 = arith.constant 0 : i32
    %c0_i32_0 = arith.constant 0 : i32
    %c0_i32_1 = arith.constant 0 : i32
    return %c0_i32, %c0_i32_0 : i32, i32
  }
  func.func @transform_2(%arg0: i32, %arg1: i32) -> (i32, i32) {
    %c0_i32 = arith.constant 0 : i32
    %c0_i32_0 = arith.constant 0 : i32
    %c0_i32_1 = arith.constant 0 : i32
    return %c0_i32, %c0_i32_0 : i32, i32
  }
  func.func @transform_3(%arg0: i32, %arg1: i32) -> (i32, i32, i32) {
    %c0_i32 = arith.constant 0 : i32
    %c0_i32_0 = arith.constant 0 : i32
    return %arg0, %c0_i32, %arg1 : i32, i32, i32
  }
}

</mosaic_0001>

<bundles_post_ra>
// kernel: _lambda_.3
= control target key start
LH: loop header
LB: loop body
LE: loop exit
PB: predicated region body
PF: predicated region fallthrough
CT: control target
= control target key end

     0   :  { %s579_s12 = smov 0   ;;  %s581_s13 = smov 0   ;;  %s644_s0 = inlined_call_operand.vmem [shape: bf16[2,64,27], index: 0, kind: input, shape index: {}]   ;;  %s645_s1 = inlined_call_operand.vmem [shape: bf16[32,27], index: 1, kind: input, shape index: {}]   ;;  %s646_s2 = inlined_call_operand.vmem [shape: f32[32,1], index: 2, kind: input, shape index: {}]   ;;  %s647_s3 = inlined_call_operand.vmem [shape: bf16[2,32,64], index: 3, kind: output, shape index: {}]  }
   0x1   :  { %s583_s14 = smov 0  }
   0x2 LB: > { %s25_s15 = sadd.s32 1, %s552_s13  ;;  %p454_p0 = scmp.ge.s32.totalorder %s556_s14, 1  ;;  %s556_s14 = sphi %s583_s14, %s13_s14   ;;  %s552_s13 = sphi %s581_s13, %s649_s13   ;;  %s548_s12 = sphi %s579_s12, %s648_s12  }
   0x3   : > { %p27_p1 = scmp.ge.s32.totalorder %s25_s15, 2  ;;  %p158_p2 = scmp.lt.s32.totalorder %s556_s14, 3 }
   0x5   : > { %s651_s15 = smov (%p27_p1, %s25_s15), 0  ;;  %p159_p3 = pnand %p454_p0, %p158_p2 }
   0x6   : > { %p190_p4 = scmp.lt.s32.totalorder (!%p159_p3), %s548_s12, 1  ;;  %v532_v0 = vld [vmem:[%s645_s1] sm:$0xff] (!%p159_p3)   ;;  %vm274_vm0 = vcmask (!%p159_p3), 220160   ;;  %v558_v1 = vmov (!%p159_p3), 0   ;;  %v222_v2 = vld [vmem:[%s646_s2 + $0x10] sm:$0xff] (!%p159_p3)  ;;  %v223_v4 = vld [vmem:[%s646_s2 + $0x18] sm:$0xff] (!%p159_p3) }
   0x7   : > { %162 = sbr.rel (%p159_p3) target bundleno = 272 (0x110), region = 32  ;;  %527 = vset.pattern.permute.xlu1 (!%p159_p3), %v558_v1  ;;  %526 = vset.pattern.permute.xlu0 (!%p159_p3), %v558_v1  ;;  %v220_v3 = vld [vmem:[%s646_s2] sm:$0xff] (!%p159_p3)  ;;  %v221_v5 = vld [vmem:[%s646_s2 + $0x8] sm:$0xff] (!%p159_p3)  ;;  %vm362_vm1 = vcmask (!%p159_p3), 519168  }
   0x8   : > { %493 = vmatprep.mubr.msk.bf16.mxu0 (!%p159_p3), %vm274_vm0, %v532_v0  ;;  %236 = vperm.xlu1 (!%p159_p3), %527, %v222_v2   ;;  %v533_v14 = vld [vmem:[%s645_s1 + $0x8] sm:$0xff] (!%p159_p3)  }
   0x9   : > { %226 = vperm.xlu0 (!%p159_p3), %526, %v220_v3  }
   0xc   : > { %241 = vperm.xlu1 (!%p159_p3), %527, %v223_v4  }
   0xd   : > { %231 = vperm.xlu0 (!%p159_p3), %526, %v221_v5  }
   0xe   : > { %s653_s12 = smov (!%p190_p4, %s548_s12), 1 }
   0xf   : > { %s473_s22 = sshll.u32 %s653_s12, 5  ;;  %s474_s5 = sshll.u32 %s653_s12, 4 }
  0x10   : > { %s197_s27 = scalar_lea.vmem %s644_s0, %s473_s22  ;;  %s206_s8 = scalar_lea.vmem %s647_s3, %s474_s5 }
  0x11   : > { %v528_v6 = vld [vmem:[%s197_s27] sm:$0xff]   ;;  %v529_v7 = vld [vmem:[%s197_s27 + $0x8] sm:$0xff]   ;;  %v530_v10 = vld [vmem:[%s197_s27 + $0x10] sm:$0xff]  }
  0x12   : > { %497 = vmatprep.subr.msk.bf16.mxu0 %vm274_vm0, %v528_v6  ;;  %v282_v8 = vsel %vm274_vm0, %v528_v6, 0  ;;  %v285_v9 = vsel %vm274_vm0, %v529_v7, 0  ;;  %v288_v11 = vsel %vm274_vm0, %v530_v10, 0  ;;  %v531_v12 = vld [vmem:[%s197_s27 + $0x18] sm:$0xff]  }
  0x13   : > { %486 = vmatpush3.bf16.xpose.msra.mxu0 %v282_v8  ;;  %v291_v13 = vsel %vm274_vm0, %v531_v12, 0 }
  0x14   : > { %498 = vmatprep.subr.msk.bf16.mxu0 %vm274_vm0, %v529_v7 }
  0x1b   : > { %488 = vmatpush3.bf16.xpose.msra.mxu0 %v285_v9 }
  0x1c   : > { %499 = vmatprep.subr.msk.bf16.mxu0 %vm274_vm0, %v530_v10 }
  0x23   : > { %490 = vmatpush3.bf16.xpose.msra.mxu0 %v288_v11 }
  0x24   : > { %500 = vmatprep.subr.msk.bf16.mxu0 %vm274_vm0, %v531_v12 }
  0x2b   : > { %492 = vmatpush3.bf16.xpose.msra.mxu0 %v291_v13 }
  0x32   : > { %494 = vmatmul.mubr.msk.bf16.vlgmr.msra.gmra.mrb[0].mxu0 %vm274_vm0, %v533_v14 }
  0x87   : > { %v237_v15 = vpop.permute.xlu1 %236 }
  0x88   : > { %v227_v16 = vpop.permute.xlu0 %226 }
  0x8b   : > { %v242_v20 = vpop.permute.xlu1 %241 }
  0x8c   : > { %v232_v23 = vpop.permute.xlu0 %231 }
 0x105   : > { %v495_v17 = vpop.f32.mrb[0].mxu0 }
 0x106   : > { %v336_v18 = vadd.f32 %v495_v17, %v237_v15  ;;  %v327_v19 = vpop.f32.mrb[1].mxu0 }
 0x107   : > { %v328_v21 = vadd.f32 %v327_v19, %v227_v16  ;;  %v496_v22 = vpop.f32.mrb[2].mxu0 }
 0x108   : > { %v344_v24 = vmax.f32 %v336_v18, 0.0  ;;  %v339_v25 = vadd.f32 %v496_v22, %v242_v20  ;;  %v330_v26 = vpop.f32.mrb[3].mxu0 }
 0x109   : > { %v342_v27 = vmax.f32 %v328_v21, 0.0  ;;  %v331_v28 = vadd.f32 %v330_v26, %v232_v23 }
 0x10a   : > { %v477_v29 = vpack.c.bf16 %v344_v24, %v344_v24  ;;  %v345_v30 = vmax.f32 %v339_v25, 0.0 }
 0x10b   : > { %v475_v31 = vpack.c.bf16 %v342_v27, %v342_v27  ;;  %v343_v32 = vmax.f32 %v331_v28, 0.0 }
 0x10c   : > { %365 = vst.msk [vmem:[%s206_s8 + $0x8] sm:$0xf] %vm362_vm1, %v477_v29  ;;  %v478_v33 = vpack.c.bf16 %v345_v30, %v345_v30 }
 0x10d   : > { %363 = vst.msk [vmem:[%s206_s8] sm:$0xf] %vm362_vm1, %v475_v31  ;;  %v476_v34 = vpack.c.bf16 %v343_v32, %v343_v32 }
 0x10e   : > { %366 = vst.msk [vmem:[%s206_s8 + $0xc] sm:$0xf] %vm362_vm1, %v478_v33 }
 0x10f   : > { %364 = vst.msk [vmem:[%s206_s8 + $0x4] sm:$0xf] %vm362_vm1, %v476_v34 }
 0x110 PF: > { %s13_s14 = sadd.s32 1, %s556_s14   ;;  %s648_s12 = smov %s552_s13 }
 0x111   : > { %p10_p5 = scmp.ge.s32.totalorder %s13_s14, 4   ;;  %s649_s13 = smov %s651_s15 }
 0x113   :  { %12 = sbr.rel (!%p10_p5) target bundleno = 2 (0x2), region = 62 }

// kernel: _lambda_.2
= control target key start
LH: loop header
LB: loop body
LE: loop exit
PB: predicated region body
PF: predicated region fallthrough
CT: control target
= control target key end

     0   :  { %s556_s9 = smov 0   ;;  %s558_s10 = smov 0   ;;  %s616_s0 = inlined_call_operand.vmem [shape: bf16[2,64,27], index: 0, kind: input, shape index: {}]   ;;  %s617_s1 = inlined_call_operand.vmem [shape: bf16[27,32], index: 1, kind: input, shape index: {}]   ;;  %s618_s2 = inlined_call_operand.vmem [shape: f32[2,1,8,32], index: 2, kind: output, shape index: {}]  }
   0x1   :  { %s560_s11 = smov 0  }
   0x2 LB: > { %s24_s12 = sadd.s32 1, %s534_s10  ;;  %p446_p0 = scmp.ge.s32.totalorder %s538_s11, 1  ;;  %s538_s11 = sphi %s560_s11, %s12_s11   ;;  %s534_s10 = sphi %s558_s10, %s620_s10   ;;  %s530_s9 = sphi %s556_s9, %s619_s9  }
   0x3   : > { %p26_p1 = scmp.ge.s32.totalorder %s24_s12, 2  ;;  %p133_p2 = scmp.lt.s32.totalorder %s538_s11, 3 }
   0x5   : > { %s622_s12 = smov (%p26_p1, %s24_s12), 0  ;;  %p134_p3 = pnand %p446_p0, %p133_p2 }
   0x6   : > { %v510_v0 = vld [vmem:[%s617_s1] sm:$0xff] (!%p134_p3)   ;;  %vm235_vm0 = vcmask (!%p134_p3), 1044480   ;;  %v511_v1 = vld [vmem:[%s617_s1 + $0x8] sm:$0x3f] (!%p134_p3)   ;;  %vm236_vm1 = vcmask (!%p134_p3), 1045504   ;;  %p162_p4 = scmp.lt.s32.totalorder (!%p134_p3), %s530_s9, 1  ;;  %v358_v59 = vlaneseq (!%p134_p3) }
   0x7   : > { %137 = sbr.rel (%p134_p3) target bundleno = 266 (0x10a), region = 28  ;;  %469 = vmatprep.subr.bf16.mxu0 (!%p134_p3), %v510_v0  ;;  %481 = vmatprep.subr.bf16.mxu1 (!%p134_p3), %v510_v0  ;;  %v540_v2 = vmov (!%p134_p3), 65535   ;;  %vm222_vm2 = vcmask (!%p134_p3), 220160   ;;  %vm307_vm3 = vcmask (!%p134_p3), 261120  }
   0x8   : > { %470 = vmatpush3.bf16.msra.mxu0 (!%p134_p3), %v510_v0  ;;  %v237_v3 = vsel (!%p134_p3), %vm235_vm0, 4294967295, %v540_v2  ;;  %483 = vmatpush3.bf16.msra.mxu1 (!%p134_p3), %v510_v0  ;;  %v359_v0 = vshrl.u32 (!%p134_p3), %v358_v59, 7 }
   0x9   : > { %v238_v4 = vsel (!%p134_p3), %vm236_vm1, %v237_v3, 0 }
   0xa   : > { %v240_v5 = vand.u32 (!%p134_p3), %v511_v1, %v238_v4  ;;  %vm361_vm4 = vcmp.eq.s32.totalorder (!%p134_p3), %v359_v0, 1  ;;  %vm360_vm5 = vcmp.eq.s32.totalorder (!%p134_p3), %v359_v0, 0 }
   0xc   : > { %471 = vmatprep.subr.bf16.mxu0 (!%p134_p3), %v240_v5  ;;  %482 = vmatprep.subr.bf16.mxu1 (!%p134_p3), %v240_v5 }
   0xd   : > { %472 = vmatpush3.bf16.msra.mxu0 (!%p134_p3), %v240_v5  ;;  %484 = vmatpush3.bf16.msra.mxu1 (!%p134_p3), %v240_v5 }
   0xe   : > { %s624_s9 = smov (!%p162_p4, %s530_s9), 1 }
   0xf   : > { %s462_s17 = sshll.u32 %s624_s9, 5  ;;  %s449_s21 = sshll.u32 %s624_s9, 3 }
  0x10   : > { %s169_s20 = scalar_lea.vmem %s616_s0, %s462_s17  ;;  %s177_s24 = scalar_lea.vmem %s618_s2, %s449_s21 }
  0x11   : > { %v512_v6 = vld [vmem:[%s169_s20] sm:$0xff]   ;;  %v513_v7 = vld [vmem:[%s169_s20 + $0x8] sm:$0xff]   ;;  %v514_v8 = vld [vmem:[%s169_s20 + $0x10] sm:$0xff]  }
  0x12   : > { %473 = vmatprep.mubr.msk.bf16.mxu0 %vm222_vm2, %v512_v6  ;;  %v515_v9 = vld [vmem:[%s169_s20 + $0x18] sm:$0xff]   ;;  %477 = vmatprep.mubr.msk.bf16.mxu1 %vm222_vm2, %v514_v8 }
  0x13   : > { %474 = vmatmul.mubr.msk.bf16.vlgmr.msra.gmra.mrb[0].mxu0 %vm222_vm2, %v513_v7  ;;  %478 = vmatmul.mubr.msk.bf16.vlgmr.msra.gmra.mrb[0].mxu1 %vm222_vm2, %v515_v9 }
  0xe6   : > { %v475_v10 = vpop.f32.mrb[0].mxu0  ;;  %v479_v14 = vpop.f32.mrb[0].mxu1 }
  0xe7   : > { %v276_v11 = vpop.f32.mrb[1].mxu0  ;;  %v292_v16 = vpop.f32.mrb[1].mxu1  ;;  %v331_v17 = vmul.f32 %v475_v10, %v475_v10  ;;  %v311_v22 = vsel %vm307_vm3, %v475_v10, 0.0  ;;  %v335_v41 = vmul.f32 %v479_v14, %v479_v14  ;;  %v319_v45 = vsel %vm307_vm3, %v479_v14, 0.0 }
  0xe8   : > { %v329_v12 = vmul.f32 %v276_v11, %v276_v11  ;;  %v476_v13 = vpop.f32.mrb[2].mxu0  ;;  %v308_v18 = vsel %vm307_vm3, %v276_v11, 0.0  ;;  %v480_v21 = vpop.f32.mrb[2].mxu1  ;;  %v333_v28 = vmul.f32 %v292_v16, %v292_v16  ;;  %v315_v33 = vsel %vm307_vm3, %v292_v16, 0.0 }
  0xe9   : > { %v279_v15 = vpop.f32.mrb[3].mxu0  ;;  %v295_v24 = vpop.f32.mrb[3].mxu1  ;;  %v332_v26 = vmul.f32 %v476_v13, %v476_v13  ;;  %v340_v31 = vsel %vm307_vm3, %v331_v17, 0.0  ;;  %v313_v32 = vsel %vm307_vm3, %v476_v13, 0.0  ;;  %v336_v46 = vmul.f32 %v480_v21, %v480_v21 }
  0xea   : > { %v309_v19 = vsel %vm307_vm3, %v279_v15, 0.0  ;;  %v330_v20 = vmul.f32 %v279_v15, %v279_v15  ;;  %v337_v25 = vsel %vm307_vm3, %v329_v12, 0.0  ;;  %v344_v37 = vsel %vm307_vm3, %v333_v28, 0.0 }
  0xeb   : > { %v310_v23 = vadd.f32 %v309_v19, %v308_v18  ;;  %v342_v36 = vsel %vm307_vm3, %v332_v26, 0.0  ;;  %v334_v38 = vmul.f32 %v295_v24, %v295_v24  ;;  %v317_v42 = vsel %vm307_vm3, %v295_v24, 0.0 }
  0xec   : > { %v338_v27 = vsel %vm307_vm3, %v330_v20, 0.0  ;;  %v348_v50 = vsel %vm307_vm3, %v335_v41, 0.0  ;;  %v321_v51 = vsel %vm307_vm3, %v480_v21, 0.0  ;;  %v350_v54 = vsel %vm307_vm3, %v336_v46, 0.0 }
  0xed   : > { %v312_v29 = vadd.f32 %v311_v22, %v310_v23  ;;  %v339_v30 = vadd.f32 %v338_v27, %v337_v25  ;;  %v346_v47 = vsel %vm307_vm3, %v334_v38, 0.0 }
  0xef   : > { %v341_v34 = vadd.f32 %v340_v31, %v339_v30  ;;  %v314_v35 = vadd.f32 %v313_v32, %v312_v29 }
  0xf1   : > { %v316_v39 = vadd.f32 %v315_v33, %v314_v35  ;;  %v343_v40 = vadd.f32 %v342_v36, %v341_v34 }
  0xf3   : > { %v345_v43 = vadd.f32 %v344_v37, %v343_v40  ;;  %v318_v44 = vadd.f32 %v317_v42, %v316_v39 }
  0xf5   : > { %v320_v48 = vadd.f32 %v319_v45, %v318_v44  ;;  %v347_v49 = vadd.f32 %v346_v47, %v345_v43 }
  0xf7   : > { %v322_v52 = vadd.f32 %v321_v51, %v320_v48  ;;  %v349_v53 = vadd.f32 %v348_v50, %v347_v49 }
  0xf9   : > { %v323_v55 = vrot.slane %v322_v52, 4  ;;  %v351_v56 = vadd.f32 %v350_v54, %v349_v53 }
  0xfb   : > { %v324_v57 = vadd.f32 %v323_v55, %v322_v52  ;;  %v352_v58 = vrot.slane %v351_v56, 4 }
  0xfd   : > { %v325_v60 = vrot.slane %v324_v57, 2  ;;  %v353_v61 = vadd.f32 %v352_v58, %v351_v56 }
  0xff   : > { %v326_v62 = vadd.f32 %v325_v60, %v324_v57  ;;  %v354_v63 = vrot.slane %v353_v61, 2 }
 0x101   : > { %v355_v1 = vadd.f32 %v354_v63, %v353_v61  ;;  %v327_v2 = vrot.slane %v326_v62, 1 }
 0x103   : > { %v356_v3 = vrot.slane %v355_v1, 1  ;;  %v328_v5 = vadd.f32 %v327_v2, %v326_v62 }
 0x105   : > { %v357_v4 = vadd.f32 %v356_v3, %v355_v1 }
 0x107   : > { %v362_v6 = vsel %vm361_vm4, %v357_v4, 0.0 }
 0x108   : > { %v363_v7 = vsel %vm360_vm5, %v328_v5, %v362_v6 }
 0x109   : > { %364 = vst.msk [vmem:[%s177_s24] sm:$0xff] %vm307_vm3, %v363_v7 }
 0x10a PF: > { %s12_s11 = sadd.s32 1, %s538_s11   ;;  %s619_s9 = smov %s534_s10 }
 0x10b   : > { %p9_p5 = scmp.ge.s32.totalorder %s12_s11, 4   ;;  %s620_s10 = smov %s622_s12 }
 0x10d   :  { %11 = sbr.rel (!%p9_p5) target bundleno = 2 (0x2), region = 58 }

</bundles_post_ra>
